<compile_context>
chip_gen: v7x
topology: tpu7x:2x2x1
jax: 0.10.0
libtpu: 0.0.40
codegen_flags: <defaults>
</compile_context>

<pallas_src>
import functools
import math

import jax
import jax.numpy as jnp
from jax.experimental import pallas as pl
from jax.experimental.pallas import tpu as pltpu

LANES = 128
# clamp(p, 1e-4, 1 - 1e-4)  <=>  clamp(logit, -LOGIT_CLAMP, +LOGIT_CLAMP)
_LOGIT_CLAMP = math.log((1.0 - 1e-4) / 1e-4)   # = log(9999) ~ 9.21024


def _round_up(x, m):
    return -(-x // m) * m


def _num_tensorcores():
    """2 only on v7x-class chips (2 TensorCores / chip); 1 on v5e/v6e/unknown."""
    try:
        kind = jax.devices()[0].device_kind.lower()
    except Exception:
        return 1
    return 2 if ("v7" in kind or "tpu7" in kind) else 1


def _chunk_partial(x, g):
    """Focal-loss partials for one (chunk_rows, 128) f32 chunk.

    Returns (loss8, pos8): sublane-partial sums of shape (8, 128).
    """
    # log-sigmoid reformulation: exp + log (2 heavy EUP ops) instead of
    # sigmoid + log + log.  Clamping the logit == clamping p to [1e-4, 0.9999].
    xc = jnp.clip(x, -_LOGIT_CLAMP, _LOGIT_CLAMP)
    e = jnp.exp(-xc)
    one_p_e = 1.0 + e
    s = jnp.log(one_p_e)                       # = -log(p)
    p = pl.reciprocal(one_p_e, approx=True)    # = sigmoid(xc), EUP slot
    one_m_p = e * p                            # = 1 - p

    pos = (g == 1.0).astype(jnp.float32)
    neg = (g < 1.0).astype(jnp.float32)
    omg = 1.0 - g
    nw = omg * omg
    nw = nw * nw                               # (1 - gt)^4

    log_p = -s
    log_1mp = -xc - s
    loss = (log_p * (one_m_p * one_m_p) * pos
            + log_1mp * (p * p) * (nw * neg))

    r8 = x.shape[0] // 8
    loss8 = loss.reshape(r8, 8, LANES).sum(axis=0)
    pos8 = pos.reshape(r8, 8, LANES).sum(axis=0)
    return loss8, pos8


def _focal_sums_kernel(pred_ref, gt_ref, out_ref, *, tile_rows, chunk_rows,
                       total_rows, tiles_per_core, needs_mask, two_d_grid,
                       unroll):
    if two_d_grid:
        c = pl.program_id(0)          # TensorCore split (CORE_PARALLEL, v7x)
        i = pl.program_id(1)          # row-tile reduction (ARBITRARY)
    else:
        c = 0
        i = pl.program_id(0)

    @pl.when(i == 0)
    def _init():
        out_ref[...] = jnp.zeros_like(out_ref)

    n_chunks = tile_rows // chunk_rows
    tile_idx = c * tiles_per_core + i
    tile_start = tile_idx * tile_rows

    def run_chunks(mask_rows):
        def body(j, carry):
            loss_acc, pos_acc = carry
            off = pl.multiple_of(j * chunk_rows, chunk_rows)
            x = pred_ref[pl.ds(off, chunk_rows), :].astype(jnp.float32)
            g = gt_ref[pl.ds(off, chunk_rows), :].astype(jnp.float32)
            if mask_rows:
                # Rows >= total_rows are phantom / OOB garbage: *select* them
                # (not multiply) to inert values so NaN garbage cannot leak.
                row_id = (tile_start + off
                          + jax.lax.broadcasted_iota(jnp.int32, x.shape, 0))
                valid = row_id < total_rows
                x = jnp.where(valid, x, 0.0)
                g = jnp.where(valid, g, 2.0)   # gt=2 -> pos=neg=0
            l8, p8 = _chunk_partial(x, g)
            return loss_acc + l8, pos_acc + p8

        zero = jnp.zeros((8, LANES), jnp.float32)
        if n_chunks == 1:
            return body(0, (zero, zero))
        return jax.lax.fori_loop(0, n_chunks, body, (zero, zero),
                                 unroll=unroll)

    if not needs_mask:
        l8, p8 = run_chunks(False)
        out_ref[0] = out_ref[0] + l8
        out_ref[1] = out_ref[1] + p8
    else:
        is_full = tile_start + tile_rows <= total_rows

        @pl.when(is_full)
        def _interior():                       # mask-free fast path
            l8, p8 = run_chunks(False)
            out_ref[0] = out_ref[0] + l8
            out_ref[1] = out_ref[1] + p8

        @pl.when(jnp.logical_not(is_full))
        def _edge():                           # ragged / phantom tiles only
            l8, p8 = run_chunks(True)
            out_ref[0] = out_ref[0] + l8
            out_ref[1] = out_ref[1] + p8


def keypoint_focal_loss(pred_logits, label, *, tile_rows=2048, num_cores=None):
    """CornerNet focal loss.  pred_logits: raw logits (B,C,H,W); label: heatmap.

    Inputs are streamed in their native dtypes (bf16 pred is fine; only pass a
    bf16 label if it was *produced* in bf16, so the gt==1 test stays exact).
    """
    if num_cores is None:
        num_cores = _num_tensorcores()

    total = pred_logits.size
    pred_flat = pred_logits.reshape(-1)
    gt_flat = label.reshape(-1)

    # Pad (only when needed) to a 128-lane multiple and >= 8 rows with inert
    # elements (gt=2 -> pos=neg=0; any finite logit) so the entire reduction
    # stays in-kernel and no separate remainder pass is needed.
    # TODO(synk): for non-128-divisible sizes this pad still costs one HBM
    # copy; a 1-D-block kernel would avoid it but isn't worth the complexity.
    padded_total = max(8 * LANES, _round_up(total, LANES))
    if padded_total != total:
        pad = padded_total - total
        pred_flat = jnp.pad(pred_flat, (0, pad))
        gt_flat = jnp.pad(gt_flat, (0, pad), constant_values=2)
    rows = padded_total // LANES

    # Free (layout-preserving) views when total is already 128-divisible.
    pred2 = pred_flat.reshape(rows, LANES)
    gt2 = gt_flat.reshape(rows, LANES)

    # Tile / chunk geometry: tiles are multiples of the 64-row inner chunk
    # (or a single chunk for small inputs); only the last tile can be ragged.
    tile_rows = max(64, (tile_rows // 64) * 64)
    if rows >= 64:
        tile_rows_eff = min(tile_rows, (rows // 64) * 64)
        chunk_rows = 64
    else:
        tile_rows_eff = (rows // 8) * 8
        chunk_rows = tile_rows_eff
    n_chunks = tile_rows_eff // chunk_rows
    unroll = next(u for u in (8, 4, 2, 1) if n_chunks % u == 0)

    n_blocks = -(-rows // tile_rows_eff)
    tiles_per_core = -(-n_blocks // num_cores)
    needs_mask = (num_cores * tiles_per_core * tile_rows_eff != rows)

    kernel = functools.partial(
        _focal_sums_kernel,
        tile_rows=tile_rows_eff,
        chunk_rows=chunk_rows,
        total_rows=rows,
        tiles_per_core=tiles_per_core,
        needs_mask=needs_mask,
        two_d_grid=(num_cores > 1),
        unroll=unroll,
    )

    if num_cores > 1:
        def in_map(c, i):
            # Phantom tiles of the last core are clamped into range (their
            # rows are fully masked in-kernel) so DMAs never go out of bounds.
            return (jnp.minimum(c * tiles_per_core + i, n_blocks - 1), 0)

        partials = pl.pallas_call(
            kernel,
            out_shape=jax.ShapeDtypeStruct((num_cores, 2, 8, LANES),
                                           jnp.float32),
            grid=(num_cores, tiles_per_core),
            in_specs=[
                pl.BlockSpec((tile_rows_eff, LANES), in_map),
                pl.BlockSpec((tile_rows_eff, LANES), in_map),
            ],
            out_specs=pl.BlockSpec((None, 2, 8, LANES),
                                   lambda c, i: (c, 0, 0, 0)),
            compiler_params=pltpu.CompilerParams(
                dimension_semantics=(pltpu.CORE_PARALLEL, pltpu.ARBITRARY)),
        )(pred2, gt2)
    else:
        partials = pl.pallas_call(
            kernel,
            out_shape=jax.ShapeDtypeStruct((2, 8, LANES), jnp.float32),
            grid=(tiles_per_core,),
            in_specs=[
                pl.BlockSpec((tile_rows_eff, LANES), lambda i: (i, 0)),
                pl.BlockSpec((tile_rows_eff, LANES), lambda i: (i, 0)),
            ],
            out_specs=pl.BlockSpec((2, 8, LANES), lambda i: (0, 0, 0)),
            compiler_params=pltpu.CompilerParams(
                dimension_semantics=("arbitrary",)),
        )(pred2, gt2)
        partials = partials[None]

    loss_sum = partials[:, 0].sum()    # pos_loss + neg_loss
    num_pos = partials[:, 1].sum()
    # TODO(synk): the data-dependent scalar branch (num_pos == 0) stays in JAX.
    safe_den = jnp.where(num_pos == 0.0, 1.0, num_pos)
    return jnp.where(num_pos == 0.0, -loss_sum, -loss_sum / safe_den)


def _reference_loss(pred_logits, label):
    p = jnp.clip(jax.nn.sigmoid(pred_logits.astype(jnp.float32)),
                 1e-4, 1.0 - 1e-4)
    gt = label.astype(jnp.float32)
    pos = (gt == 1.0).astype(jnp.float32)
    neg = (gt < 1.0).astype(jnp.float32)
    nw = (1.0 - gt) ** 4
    pos_loss = jnp.sum(jnp.log(p) * (1.0 - p) ** 2 * pos)
    neg_loss = jnp.sum(jnp.log(1.0 - p) * p ** 2 * nw * neg)
    num_pos = jnp.sum(pos)
    return jnp.where(num_pos == 0.0, -neg_loss,
                     -(pos_loss + neg_loss) / jnp.where(num_pos == 0.0, 1.0,
                                                        num_pos))


if __name__ == "__main__":
    key = jax.random.PRNGKey(0)
    k1, k2, k3, k4 = jax.random.split(key, 4)

    B, C, H, W = 2, 4, 16, 16
    pred = jax.random.normal(k1, (B, C, H, W), dtype=jnp.float32)
    # Heatmap-like ground truth in [0, 0.9) with a few exact 1.0 peaks.
    u = jax.random.uniform(k2, (B, C, H, W), dtype=jnp.float32)
    label = jnp.where(u > 0.97, 1.0, u * 0.9)

    loss = keypoint_focal_loss(pred, label)
    jax.block_until_ready(loss)
    ref = _reference_loss(pred, label)
    assert jnp.allclose(loss, ref, rtol=2e-3, atol=1e-4), (loss, ref)

    # Exercise the num_pos == 0 branch as well.
    label0 = u * 0.9
    loss0 = keypoint_focal_loss(pred, label0)
    jax.block_until_ready(loss0)
    ref0 = _reference_loss(pred, label0)
    assert jnp.allclose(loss0, ref0, rtol=2e-3, atol=1e-4), (loss0, ref0)

    # Ragged (non-128-divisible) shape exercises the pad + edge-masked path.
    pred_r = jax.random.normal(k3, (2, 3, 15, 13), dtype=jnp.float32)
    ur = jax.random.uniform(k4, (2, 3, 15, 13), dtype=jnp.float32)
    label_r = jnp.where(ur > 0.97, 1.0, ur * 0.9)
    loss_r = keypoint_focal_loss(pred_r, label_r)
    jax.block_until_ready(loss_r)
    ref_r = _reference_loss(pred_r, label_r)
    assert jnp.allclose(loss_r, ref_r, rtol=2e-3, atol=1e-4), (loss_r, ref_r)

    print("KERNEL_OK")
</pallas_src>

<mosaic_0001>
module attributes {stable_mosaic.version = 11 : i64} {
  func.func @_focal_sums_kernel(%arg0: i32, %arg1: memref<16x128xf32, #tpu.memory_space<vmem>>, %arg2: memref<16x128xf32, #tpu.memory_space<vmem>>, %arg3: memref<2x8x128xf32, #tpu.memory_space<vmem>>) attributes {dimension_semantics = [#tpu.dimension_semantics<arbitrary>], iteration_bounds = array<i64: 1>, scalar_prefetch = 0 : i64, scratch_operands = 0 : i64, tpu.core_type = #tpu.core_type<tc>, window_params = [{transform_indices = @transform_0, window_bounds = array<i64: 16, 128>}, {transform_indices = @transform_1, window_bounds = array<i64: 16, 128>}, {pipeline_mode = #tpu.pipeline_mode<synchronous>, transform_indices = @transform_2, window_bounds = array<i64: 2, 8, 128>}]} {
    %c0_i32 = arith.constant 0 : i32
    %0 = arith.cmpi eq, %arg0, %c0_i32 : i32
    %1 = arith.extui %0 : i1 to i32
    %c0_i32_0 = arith.constant 0 : i32
    %2 = arith.cmpi ne, %1, %c0_i32_0 : i32
    scf.if %2 {
      %cst_25 = arith.constant 0.000000e+00 : f32
      %64 = vector.broadcast %cst_25 : f32 to vector<2x8x128xf32>
      %c0_26 = arith.constant 0 : index
      %c0_27 = arith.constant 0 : index
      %c0_28 = arith.constant 0 : index
      %65 = vector.load %arg3[%c0_26, %c0_27, %c0_28] : memref<2x8x128xf32, #tpu.memory_space<vmem>>, vector<2x8x128xf32>
      tpu.vector_store %arg3[%c0_26, %c0_27, %c0_28], %64 {strides = array<i32>} : memref<2x8x128xf32, #tpu.memory_space<vmem>>, vector<2x8x128xf32>,
    } else {
    }
    %cst = arith.constant 0.000000e+00 : f32
    %3 = vector.broadcast %cst : f32 to vector<8x128xf32>
    %c0_i32_1 = arith.constant 0 : i32
    %4 = tpu.assume_multiple %c0_i32_1, 16 : i32
    %5 = arith.index_cast %4 : i32 to index
    %c0 = arith.constant 0 : index
    %6 = vector.load %arg1[%5, %c0] : memref<16x128xf32, #tpu.memory_space<vmem>>, vector<16x128xf32>
    %7 = arith.index_cast %4 : i32 to index
    %c0_2 = arith.constant 0 : index
    %8 = vector.load %arg2[%7, %c0_2] : memref<16x128xf32, #tpu.memory_space<vmem>>, vector<16x128xf32>
    %cst_3 = arith.constant -9.210240e+00 : f32
    %cst_4 = arith.constant 9.210240e+00 : f32
    %9 = vector.broadcast %cst_3 : f32 to vector<16x128xf32>
    %10 = arith.maximumf %9, %6 : vector<16x128xf32>
    %11 = vector.broadcast %cst_4 : f32 to vector<16x128xf32>
    %12 = arith.minimumf %11, %10 : vector<16x128xf32>
    %cst_5 = arith.constant 0.000000e+00 : f32
    %13 = vector.broadcast %cst_5 : f32 to vector<16x128xf32>
    %14 = arith.subf %13, %12 : vector<16x128xf32>
    %15 = math.exp %14 : vector<16x128xf32>
    %cst_6 = arith.constant 1.000000e+00 : f32
    %16 = vector.broadcast %cst_6 : f32 to vector<16x128xf32>
    %17 = arith.addf %16, %15 : vector<16x128xf32>
    %18 = math.log %17 : vector<16x128xf32>
    %19 = tpu.reciprocal %17 {approx = true} : vector<16x128xf32> -> vector<16x128xf32>
    %20 = arith.mulf %15, %19 : vector<16x128xf32>
    %cst_7 = arith.constant 1.000000e+00 : f32
    %21 = vector.broadcast %cst_7 : f32 to vector<16x128xf32>
    %22 = arith.cmpf oeq, %8, %21 : vector<16x128xf32>
    %23 = arith.extui %22 : vector<16x128xi1> to vector<16x128xi32>
    %24 = arith.sitofp %23 : vector<16x128xi32> to vector<16x128xf32>
    %cst_8 = arith.constant 1.000000e+00 : f32
    %25 = vector.broadcast %cst_8 : f32 to vector<16x128xf32>
    %26 = arith.cmpf olt, %8, %25 : vector<16x128xf32>
    %27 = arith.extui %26 : vector<16x128xi1> to vector<16x128xi32>
    %28 = arith.sitofp %27 : vector<16x128xi32> to vector<16x128xf32>
    %cst_9 = arith.constant 1.000000e+00 : f32
    %29 = vector.broadcast %cst_9 : f32 to vector<16x128xf32>
    %30 = arith.subf %29, %8 : vector<16x128xf32>
    %31 = arith.mulf %30, %30 : vector<16x128xf32>
    %32 = arith.mulf %31, %31 : vector<16x128xf32>
    %cst_10 = arith.constant 0.000000e+00 : f32
    %33 = vector.broadcast %cst_10 : f32 to vector<16x128xf32>
    %34 = arith.subf %33, %18 : vector<16x128xf32>
    %cst_11 = arith.constant 0.000000e+00 : f32
    %35 = vector.broadcast %cst_11 : f32 to vector<16x128xf32>
    %36 = arith.subf %35, %12 : vector<16x128xf32>
    %37 = arith.subf %36, %18 : vector<16x128xf32>
    %38 = arith.mulf %20, %20 : vector<16x128xf32>
    %39 = arith.mulf %34, %38 : vector<16x128xf32>
    %40 = arith.mulf %39, %24 : vector<16x128xf32>
    %41 = arith.mulf %19, %19 : vector<16x128xf32>
    %42 = arith.mulf %37, %41 : vector<16x128xf32>
    %43 = arith.mulf %32, %28 : vector<16x128xf32>
    %44 = arith.mulf %42, %43 : vector<16x128xf32>
    %45 = arith.addf %40, %44 : vector<16x128xf32>
    %46 = vector.shape_cast %45 : vector<16x128xf32> to vector<2x8x128xf32>
    %cst_12 = arith.constant dense<0.000000e+00> : vector<8x128xf32>
    %47 = vector.multi_reduction <add>, %46, %cst_12 [0] : vector<2x8x128xf32> to vector<8x128xf32>
    %48 = vector.shape_cast %24 : vector<16x128xf32> to vector<2x8x128xf32>
    %cst_13 = arith.constant dense<0.000000e+00> : vector<8x128xf32>
    %49 = vector.multi_reduction <add>, %48, %cst_13 [0] : vector<2x8x128xf32> to vector<8x128xf32>
    %50 = arith.addf %3, %47 : vector<8x128xf32>
    %51 = arith.addf %3, %49 : vector<8x128xf32>
    %c0_14 = arith.constant 0 : index
    %c0_15 = arith.constant 0 : index
    %c0_16 = arith.constant 0 : index
    %52 = vector.load %arg3[%c0_14, %c0_15, %c0_16] : memref<2x8x128xf32, #tpu.memory_space<vmem>>, vector<1x8x128xf32>
    %53 = vector.shape_cast %52 : vector<1x8x128xf32> to vector<8x128xf32>
    %54 = arith.addf %53, %50 : vector<8x128xf32>
    %c0_17 = arith.constant 0 : index
    %c0_18 = arith.constant 0 : index
    %c0_19 = arith.constant 0 : index
    %55 = vector.load %arg3[%c0_17, %c0_18, %c0_19] : memref<2x8x128xf32, #tpu.memory_space<vmem>>, vector<1x8x128xf32>
    %56 = vector.shape_cast %55 : vector<1x8x128xf32> to vector<8x128xf32>
    %57 = vector.shape_cast %54 : vector<8x128xf32> to vector<1x8x128xf32>
    tpu.vector_store %arg3[%c0_17, %c0_18, %c0_19], %57 {strides = array<i32>} : memref<2x8x128xf32, #tpu.memory_space<vmem>>, vector<1x8x128xf32>,
    %c1 = arith.constant 1 : index
    %c0_20 = arith.constant 0 : index
    %c0_21 = arith.constant 0 : index
    %58 = vector.load %arg3[%c1, %c0_20, %c0_21] : memref<2x8x128xf32, #tpu.memory_space<vmem>>, vector<1x8x128xf32>
    %59 = vector.shape_cast %58 : vector<1x8x128xf32> to vector<8x128xf32>
    %60 = arith.addf %59, %51 : vector<8x128xf32>
    %c1_22 = arith.constant 1 : index
    %c0_23 = arith.constant 0 : index
    %c0_24 = arith.constant 0 : index
    %61 = vector.load %arg3[%c1_22, %c0_23, %c0_24] : memref<2x8x128xf32, #tpu.memory_space<vmem>>, vector<1x8x128xf32>
    %62 = vector.shape_cast %61 : vector<1x8x128xf32> to vector<8x128xf32>
    %63 = vector.shape_cast %60 : vector<8x128xf32> to vector<1x8x128xf32>
    tpu.vector_store %arg3[%c1_22, %c0_23, %c0_24], %63 {strides = array<i32>} : memref<2x8x128xf32, #tpu.memory_space<vmem>>, vector<1x8x128xf32>,
    return
  }
  func.func @transform_0(%arg0: i32) -> (i32, i32) {
    %c0_i32 = arith.constant 0 : i32
    %c0_i32_0 = arith.constant 0 : i32
    return %arg0, %c0_i32 : i32, i32
  }
  func.func @transform_1(%arg0: i32) -> (i32, i32) {
    %c0_i32 = arith.constant 0 : i32
    %c0_i32_0 = arith.constant 0 : i32
    return %arg0, %c0_i32 : i32, i32
  }
  func.func @transform_2(%arg0: i32) -> (i32, i32, i32) {
    %c0_i32 = arith.constant 0 : i32
    %c0_i32_0 = arith.constant 0 : i32
    %c0_i32_1 = arith.constant 0 : i32
    %c0_i32_2 = arith.constant 0 : i32
    return %c0_i32, %c0_i32_0, %c0_i32_1 : i32, i32, i32
  }
}

</mosaic_0001>

<bundles_post_ra>
// kernel: tpu_custom_call.1
= control target key start
LH: loop header
LB: loop body
LE: loop exit
PB: predicated region body
PF: predicated region fallthrough
CT: control target
= control target key end

     0   :  { %7 = vsyncpa [#allocation3], 0  ;;  %s299_s0 = inlined_call_operand.hbm [shape: f32[16,128], index: 0, kind: input, shape index: {}]   ;;  %s300_s1 = inlined_call_operand.hbm [shape: f32[16,128], index: 1, kind: input, shape index: {}]   ;;  %s301_s2 = inlined_call_operand.hbm [shape: f32[2,8,128], index: 2, kind: output, shape index: {}]  }
   0x1   :  { %8 = vsyncpa [#allocation6], 0 }
   0x2   :  { %9 = vsyncpa [#allocation4], 0  ;;  %s233_s9 = smov [#allocation2]   ;;  %s161_s13 = scalar_lea.hbm %s299_s0, 256 }
   0x3   :  { %s15_s10 = sshll.u32 %s233_s9, 4  ;;  %p162_p0 = scmp.ne.s32.totalorder %s299_s0, %s161_s13  ;;  %s16_s10 = int_to_ptr.vmem [resolvable:$true] %s15_s10 }
   0x4   :  { %p165_p1 = scmp.lt.u32.totalorder %s161_s13, %s299_s0 }
   0x6   :  { %p167_p2 = pnand %p165_p1, %p162_p0 }
   0x8   :  { %170 = shalt.err (!%p167_p2)
}
   0x9   :  { %s171_s18 = scalar_lea.vmem %s16_s10, 256  ;;  %p176_p4 = scmp.lt.s32.totalorder %s16_s10, %s16_s10 }
   0xa   :  { %p172_p3 = scmp.ne.s32.totalorder %s16_s10, %s171_s18  ;;  %p177_p5 = scmp.lt.s32.totalorder %s171_s18, %s171_s18 }
   0xc   :  { %p178_p6 = por %p177_p5, %p176_p4 }
   0xe   :  { %p179_p7 = pnand %p178_p6, %p172_p3 }
  0x10   :  { %182 = shalt.err (!%p179_p7)
}
  0x11   :  { %s234_s19 = smov 128   ;;  %s235_s20 = smov 8  }
  0x12   :  { %21 = dma.hbm_to_vmem [thread:$0]  %s299_s0, 256, %s16_s10, [#allocation3], %s234_s19, %s234_s19, %s235_s20  }
  0x13   :  { %s236_s23 = smov [#allocation5]   ;;  %s183_s27 = scalar_lea.hbm %s300_s1, 256 }
  0x14   :  { %s27_s24 = sshll.u32 %s236_s23, 4  ;;  %p184_p8 = scmp.ne.s32.totalorder %s300_s1, %s183_s27  ;;  %s28_s24 = int_to_ptr.vmem [resolvable:$true] %s27_s24 }
  0x15   :  { %p187_p9 = scmp.lt.u32.totalorder %s183_s27, %s300_s1 }
  0x17   :  { %p189_p10 = pnand %p187_p9, %p184_p8 }
  0x19   :  { %192 = shalt.err (!%p189_p10)
}
  0x1a   :  { %s193_s4 = scalar_lea.vmem %s28_s24, 256  ;;  %p198_p12 = scmp.lt.s32.totalorder %s28_s24, %s28_s24 }
  0x1b   :  { %p194_p11 = scmp.ne.s32.totalorder %s28_s24, %s193_s4  ;;  %p199_p13 = scmp.lt.s32.totalorder %s193_s4, %s193_s4 }
  0x1d   :  { %p200_p0 = por %p199_p13, %p198_p12 }
  0x1f   :  { %p201_p1 = pnand %p200_p0, %p194_p11 }
  0x21   :  { %204 = shalt.err (!%p201_p1)
}
  0x22   :  { %33 = dma.hbm_to_vmem [thread:$0]  %s300_s1, 256, %s28_s24, [#allocation6], %s234_s19, %s234_s19, %s235_s20  }
  0x23   :  { %227 = dma.done.wait [#allocation3], 256  }
  0x24   :  { %228 = vsyncadd [#allocation3], 4294967040 }
  0x25   :  { %229 = dma.done.wait [#allocation6], 256  }
  0x26   :  { %230 = vsyncadd [#allocation6], 4294967040  ;;  %v46_v0 = vld [vmem:[#allocation2] sm:$0xff]  ;;  %v47_v1 = vld [vmem:[#allocation2 + $0x8] sm:$0xff]  ;;  %v237_v8 = vmov 0.0   ;;  %s238_s1 = smov [#allocation7]  }
  0x27   :  { %v48_v2 = vld [vmem:[#allocation5] sm:$0xff]  ;;  %v49_v3 = vld [vmem:[#allocation5 + $0x8] sm:$0xff]  ;;  %v137_v4 = vclamps-f32 %v46_v0, 9.21024  ;;  %v138_v5 = vclamps-f32 %v47_v1, 9.21024 }
  0x28   :  { %vm70_vm0 = vcmp.eq.f32.partialorder %v48_v2, 1.0  ;;  %vm71_vm1 = vcmp.eq.f32.partialorder %v49_v3, 1.0  ;;  %v82_v18 = vsub.f32 1.0, %v48_v2  ;;  %v83_v19 = vsub.f32 1.0, %v49_v3  ;;  %s124_s6 = sshll.u32 %s238_s1, 4  ;;  %s125_s6 = int_to_ptr.vmem [resolvable:$true] %s124_s6 }
  0x29   :  { %v54_v6 = vsub.f32 0.0, %v137_v4  ;;  %v55_v7 = vsub.f32 0.0, %v138_v5  ;;  %v139_v9 = vsel %vm70_vm0, 1.0, %v237_v8  ;;  %v140_v10 = vsel %vm71_vm1, 1.0, %v237_v8  ;;  %s205_s7 = scalar_lea.vmem %s125_s6, 256  ;;  %p210_p3 = scmp.lt.s32.totalorder %s125_s6, %s125_s6 }
  0x2a   :  { %v109_v11 = vadd.f32 %v140_v10, %v139_v9  ;;  %v84_v20 = vmul.f32 %v82_v18, %v82_v18  ;;  %v85_v21 = vmul.f32 %v83_v19, %v83_v19  ;;  %vm76_vm2 = vcmp.lt.f32.partialorder %v48_v2, 1.0  ;;  %p206_p2 = scmp.ne.s32.totalorder %s125_s6, %s205_s7  ;;  %p211_p4 = scmp.lt.s32.totalorder %s205_s7, %s205_s7 }
  0x2b   :  { %v56_v12 = vmul.f32 1.442695, %v54_v6  ;;  %v58_v13 = vmul.f32 1.442695, %v55_v7  ;;  %vm77_vm3 = vcmp.lt.f32.partialorder %v49_v3, 1.0  ;;  %v141_v24 = vsel %vm76_vm2, 1.0, %v237_v8 }
  0x2c   :  { %118 = vst [vmem:[#allocation7 + $0x8] sm:$0xff] %v109_v11  ;;  %v86_v22 = vmul.f32 %v84_v20, %v84_v20  ;;  %v87_v23 = vmul.f32 %v85_v21, %v85_v21  ;;  %v142_v25 = vsel %vm77_vm3, 1.0, %v237_v8  ;;  %p212_p5 = por %p211_p4, %p210_p3 }
  0x2d   :  { %149 = vpow2.f32 %v56_v12 }
  0x2e   :  { %151 = vpow2.f32 %v58_v13  ;;  %v102_v31 = vmul.f32 %v141_v24, %v86_v22  ;;  %v103_v32 = vmul.f32 %v142_v25, %v87_v23  ;;  %p213_p6 = pnand %p212_p5, %p206_p2 }
  0x37   :  { %v150_v14 = vpop.eup %149 }
  0x38   :  { %v152_v15 = vpop.eup %151  ;;  %v60_v16 = vadd.f32 1.0, %v150_v14 }
  0x39   :  { %v61_v17 = vadd.f32 1.0, %v152_v15 }
  0x3a   :  { %153 = vlog2.f32 %v60_v16 }
  0x3b   :  { %155 = vlog2.f32 %v61_v17 }
  0x3c   :  { %157 = vrcp.f32 %v60_v16 }
  0x3d   :  { %159 = vrcp.f32 %v61_v17 }
  0x44   :  { %v154_v26 = vpop.eup %153 }
  0x45   :  { %v156_v27 = vpop.eup %155  ;;  %v63_v28 = vmul.f32 0.6931472, %v154_v26 }
  0x46   :  { %v158_v29 = vpop.eup %157  ;;  %v65_v30 = vmul.f32 0.6931472, %v156_v27 }
  0x47   :  { %v160_v33 = vpop.eup %159  ;;  %v68_v34 = vmul.f32 %v158_v29, %v150_v14  ;;  %v88_v35 = vsub.f32 0.0, %v63_v28  ;;  %v90_v36 = vsub.f32 %v54_v6, %v63_v28  ;;  %v98_v37 = vmul.f32 %v158_v29, %v158_v29 }
  0x48   :  { %v69_v38 = vmul.f32 %v160_v33, %v152_v15  ;;  %v89_v39 = vsub.f32 0.0, %v65_v30  ;;  %v91_v40 = vsub.f32 %v55_v7, %v65_v30  ;;  %v99_v41 = vmul.f32 %v160_v33, %v160_v33 }
  0x49   :  { %v92_v42 = vmul.f32 %v68_v34, %v68_v34  ;;  %v100_v43 = vmul.f32 %v98_v37, %v90_v36 }
  0x4a   :  { %v93_v44 = vmul.f32 %v69_v38, %v69_v38  ;;  %v101_v45 = vmul.f32 %v99_v41, %v91_v40 }
  0x4b   :  { %v94_v46 = vmul.f32 %v92_v42, %v88_v35  ;;  %v104_v47 = vmul.f32 %v102_v31, %v100_v43 }
  0x4c   :  { %v95_v48 = vmul.f32 %v93_v44, %v89_v39  ;;  %v105_v49 = vmul.f32 %v103_v32, %v101_v45 }
  0x4d   :  { %v96_v50 = vmul.f32 %v139_v9, %v94_v46 }
  0x4e   :  { %v97_v51 = vmul.f32 %v140_v10, %v95_v48 }
  0x4f   :  { %v106_v52 = vadd.f32 %v104_v47, %v96_v50 }
  0x50   :  { %v107_v53 = vadd.f32 %v105_v49, %v97_v51 }
  0x52   :  { %v108_v54 = vadd.f32 %v107_v53, %v106_v52 }
  0x54   :  { %114 = vst [vmem:[#allocation7] sm:$0xff] %v108_v54 }
  0x55   :  { %216 = shalt.err (!%p213_p6)
}
  0x56   :  { %s217_s10 = scalar_lea.hbm %s301_s2, 256 }
  0x57   :  { %p218_p7 = scmp.ne.s32.totalorder %s301_s2, %s217_s10  ;;  %p221_p8 = scmp.lt.u32.totalorder %s217_s10, %s301_s2 }
  0x59   :  { %p223_p9 = pnand %p221_p8, %p218_p7 }
  0x5b   :  { %226 = shalt.err (!%p223_p9)
}
  0x5c   :  { %130 = dma.vmem_to_hbm [thread:$0]  %s125_s6, 256, %s301_s2, [#allocation4], %s234_s19, %s234_s19, %s235_s20  }
  0x5d   :  { %231 = dma.done.wait [#allocation4], 256  }
  0x5e   :  { %232 = vsyncadd [#allocation4], 4294967040 }
  0x5f   :  { %134 = vsyncpa [#allocation3], 1 }
  0x60   :  { %135 = vsyncpa [#allocation6], 1 }
  0x61   :  { %136 = vsyncpa [#allocation4], 1 }

</bundles_post_ra>
